<compile_context>
chip_gen: v5e
topology: v5e:2x2
jax: 0.10.0
libtpu: 0.0.40
codegen_flags: <defaults>
</compile_context>

<pallas_src>
import jax
import jax.numpy as jnp
from jax.experimental import pallas as pl
from jax.experimental.pallas import tpu as pltpu

_LANE = 128   # vreg lane width: text-batch dim padded to this -> lane-dense output
_EPS = 1e-12  # guards 0/0 -> NaN on zero / padded rows


def _round_up(n, m):
    return ((n + m - 1) // m) * m


def _choose_row_tiling(r_tot):
    """Bucketed (r_pad, tm).

    Small totals: pad to a multiple of 16 (bf16 sublane pack) and split into at
    most two full blocks (so v7x's 2 TensorCores both get work when possible).
    Large totals: 256-row tiles to amortize the ~0.35us per-grid-step overhead.
    """
    if r_tot <= 512:
        r_pad = _round_up(max(r_tot, 16), 16)
        tm = r_pad // 2 if r_pad >= 32 else r_pad   # tm stays a multiple of 8
        return r_pad, tm
    tm = 256
    return _round_up(r_tot, tm), tm


# ---------------------------------------------------------------------------
# Pallas kernel: fused region encode -> L2 normalize -> similarity vs all texts
# ---------------------------------------------------------------------------
def _region_kernel(x_ref, w_ref, t_ref, o_ref):
    """One row tile of the region path, full K in a single MXU dot.

    x_ref: (TM, K_pad) bf16      region pixels (flattened, zero-padded)
    w_ref: (K_pad, D)  bf16      image projection (loaded once, constant index)
    t_ref: (D, B_pad)  bf16      normalized text feats * exp(logit_scale), transposed
    o_ref: (TM, B_pad) f32       lane-dense similarity scores
    """
    feats = jnp.dot(x_ref[...], w_ref[...],
                    preferred_element_type=jnp.float32)          # (TM, D) f32
    # rsqrt goes to the EUP (own VLIW slot); eps keeps zero-padded rows finite.
    inv = jax.lax.rsqrt(jnp.sum(feats * feats, axis=-1, keepdims=True) + _EPS)
    r_hat = (feats * inv).astype(jnp.bfloat16)                   # (TM, D) bf16
    # Plain (TM, D) @ (D, B_pad) bf16 MXU matmul, f32 accumulate.  Text operand
    # already carries exp(logit_scale), so this is the final score.
    o_ref[...] = jnp.dot(r_hat, t_ref[...],
                         preferred_element_type=jnp.float32)


def _region_scores(x_bf16, w_bf16, t_op, tm):
    """x:(R_pad,K_pad) bf16, w:(K_pad,D) bf16, t:(D,B_pad) bf16 -> (R_pad,B_pad) f32."""
    r_pad, k_pad = x_bf16.shape
    d, b_pad = t_op.shape
    assert r_pad % tm == 0 and tm % 8 == 0 and k_pad % 128 == 0
    grid = (r_pad // tm,)
    return pl.pallas_call(
        _region_kernel,
        out_shape=jax.ShapeDtypeStruct((r_pad, b_pad), jnp.float32),
        grid=grid,
        in_specs=[
            pl.BlockSpec((tm, k_pad), lambda i: (i, 0)),     # row tile, full K
            pl.BlockSpec((k_pad, d), lambda i: (0, 0)),      # weights: loaded once
            pl.BlockSpec((d, b_pad), lambda i: (0, 0)),      # text operand: loaded once
        ],
        out_specs=pl.BlockSpec((tm, b_pad), lambda i: (i, 0)),
        compiler_params=pltpu.CompilerParams(
            # Single M axis, independent per tile -> shards across the 2 TCs on
            # v7x (no-op on v5e/v6e).
            dimension_semantics=("parallel",),
            # Explicit budget (v5e scoped default is only 16 MiB); tiles here
            # are <2 MiB even double-buffered, so plenty of headroom everywhere.
            vmem_limit_bytes=32 * 1024 * 1024,
        ),
    )(x_bf16, w_bf16, t_op)


# ---------------------------------------------------------------------------
# Single-jit forward: text path (plain jnp) + fused region pallas_call + gather
# ---------------------------------------------------------------------------
@jax.jit
def _forward_impl(regions, text_tokens, w_img_bf16, w_txt, tok_table, logit_scale):
    """regions: tuple of (R_i, 3, H, W) arrays; returns tuple of (R_i,) scores."""
    # ---- text path: tiny (B,E)@(E,D); XLA fuses embed/pool/project/normalize.
    emb = jnp.take(tok_table, text_tokens, axis=0)                 # (B, T, E)
    pooled = jnp.mean(emb, axis=1)                                 # (B, E)
    tf = jnp.dot(pooled, w_txt)                                    # (B, D) f32
    tf = tf * jax.lax.rsqrt(jnp.sum(tf * tf, axis=-1, keepdims=True) + _EPS)
    tf = tf * jnp.exp(logit_scale)                                 # pre-scale scores
    b = tf.shape[0]
    b_pad = _round_up(b, _LANE)                                    # lane-dense output
    t_op = jnp.pad(tf, ((0, b_pad - b), (0, 0))).T.astype(jnp.bfloat16)  # (D, B_pad)

    # ---- region path: concat + pad + bf16 cast, fused into this jit.
    counts = [int(r.shape[0]) for r in regions]                    # static under trace
    r_tot = sum(counts)
    x = jnp.concatenate([r.reshape(r.shape[0], -1) for r in regions], axis=0)
    k = x.shape[1]
    k_pad = w_img_bf16.shape[0]
    r_pad, tm = _choose_row_tiling(r_tot)
    x_p = jnp.pad(x, ((0, r_pad - r_tot), (0, k_pad - k))).astype(jnp.bfloat16)

    scores_all = _region_scores(x_p, w_img_bf16, t_op, tm)         # (R_pad, B_pad)

    # One on-device gather: row r of item i is matched against text column i.
    col = jnp.asarray([i for i, c in enumerate(counts) for _ in range(c)], jnp.int32)
    flat = scores_all[jnp.arange(r_tot), col]                      # (R_tot,)
    out, off = [], 0
    for c in counts:
        out.append(flat[off:off + c])
        off += c
    return tuple(out)


class CLIPMatcherPallas:
    """JAX/Pallas re-implementation of CLIPMatcher.forward semantics."""

    def __init__(self, key, *, img_hw=16, embed_dim=128, tok_embed=32, vocab=64):
        self.img_hw = img_hw
        self.embed_dim = embed_dim
        k1, k2, k3 = jax.random.split(key, 3)
        flat = 3 * img_hw * img_hw
        # TODO(synk): deterministic linear-projection stand-ins for the frozen
        # CLIP ViT-B/32 image/text encoders.
        self.w_img = (jax.random.normal(k1, (flat, embed_dim), jnp.float32)
                      / jnp.sqrt(flat))
        # Static weight prep done ONCE: pad K to a multiple of 128, cast bf16.
        k_pad = _round_up(flat, _LANE)
        self.w_img_bf16 = jnp.pad(
            self.w_img, ((0, k_pad - flat), (0, 0))).astype(jnp.bfloat16)
        self.w_txt = (jax.random.normal(k2, (tok_embed, embed_dim), jnp.float32)
                      / jnp.sqrt(tok_embed))
        self.tok_table = jax.random.normal(k3, (vocab, tok_embed), jnp.float32)
        # nn.Parameter(torch.ones([]) * 1.0)
        self.logit_scale = jnp.array(1.0, jnp.float32)

    def forward(self, region_images, text_tokens):
        """
        region_images: list of (R_i, 3, H, W) arrays (different R_i per item)
        text_tokens:   (B, T) int32 token ids (stand-in for clip.tokenize)
        returns        list of (R_i,) score arrays
        """
        outs = _forward_impl(tuple(region_images), text_tokens,
                             self.w_img_bf16, self.w_txt,
                             self.tok_table, self.logit_scale)
        return list(outs)


# ---------------------------------------------------------------------------
# Pure-JAX reference (same bf16 encoder precision) for a quick sanity check
# ---------------------------------------------------------------------------
def _reference_forward(model, region_images, text_tokens):
    emb = jnp.take(model.tok_table, text_tokens, axis=0)
    tf = jnp.mean(emb, axis=1) @ model.w_txt
    tf = tf * jax.lax.rsqrt(jnp.sum(tf * tf, axis=-1, keepdims=True) + _EPS)
    scale = jnp.exp(model.logit_scale)
    out = []
    for i, reg in enumerate(region_images):
        x = reg.reshape(reg.shape[0], -1).astype(jnp.bfloat16)
        rf = jnp.dot(x, model.w_img.astype(jnp.bfloat16),
                     preferred_element_type=jnp.float32)
        rf = rf * jax.lax.rsqrt(jnp.sum(rf * rf, axis=-1, keepdims=True) + _EPS)
        sim = jnp.sum(rf * tf[i][None, :], axis=-1)
        out.append(sim * scale)
    return out


if __name__ == "__main__":
    key = jax.random.PRNGKey(0)
    k_model, k_img0, k_img1, k_tok = jax.random.split(key, 4)

    B, H, W, T, VOCAB = 2, 16, 16, 8, 64
    model = CLIPMatcherPallas(k_model, img_hw=H)

    # Batch of 2 items with different region counts (4 and 6), NCHW images.
    region_images = [
        jax.random.normal(k_img0, (4, 3, H, W), jnp.float32),
        jax.random.normal(k_img1, (6, 3, H, W), jnp.float32),
    ]
    # Stand-in for clip.tokenize(text): deterministic token ids, shape (B, T).
    text_tokens = jax.random.randint(k_tok, (B, T), 0, VOCAB, jnp.int32)

    scores = model.forward(region_images, text_tokens)
    scores = [jax.block_until_ready(s) for s in scores]

    ref = _reference_forward(model, region_images, text_tokens)
    for s, r in zip(scores, ref):
        assert s.shape == r.shape
        assert jnp.allclose(s, r, atol=2e-2, rtol=2e-2), (s, r)

    print("KERNEL_OK")
</pallas_src>

<mosaic_0001>
module attributes {stable_mosaic.version = 11 : i64} {
  func.func @_region_kernel(%arg0: i32, %arg1: memref<16x768xbf16, #tpu.memory_space<vmem>>, %arg2: memref<768x128xbf16, #tpu.memory_space<vmem>>, %arg3: memref<128x128xbf16, #tpu.memory_space<vmem>>, %arg4: memref<16x128xf32, #tpu.memory_space<vmem>>) attributes {dimension_semantics = [#tpu.dimension_semantics<parallel>], iteration_bounds = array<i64: 1>, scalar_prefetch = 0 : i64, scratch_operands = 0 : i64, tpu.core_type = #tpu.core_type<tc>, window_params = [{transform_indices = @transform_0, window_bounds = array<i64: 16, 768>}, {pipeline_mode = #tpu.pipeline_mode<synchronous>, transform_indices = @transform_1, window_bounds = array<i64: 768, 128>}, {pipeline_mode = #tpu.pipeline_mode<synchronous>, transform_indices = @transform_2, window_bounds = array<i64: 128, 128>}, {transform_indices = @transform_3, window_bounds = array<i64: 16, 128>}]} {
    %c0 = arith.constant 0 : index
    %c0_0 = arith.constant 0 : index
    %0 = vector.load %arg1[%c0, %c0_0] : memref<16x768xbf16, #tpu.memory_space<vmem>>, vector<16x768xbf16>
    %c0_1 = arith.constant 0 : index
    %c0_2 = arith.constant 0 : index
    %1 = vector.load %arg2[%c0_1, %c0_2] : memref<768x128xbf16, #tpu.memory_space<vmem>>, vector<768x128xbf16>
    %cst = arith.constant dense<0.000000e+00> : vector<16x128xf32>
    %2 = tpu.matmul %0, %1, %cst {dimension_numbers = #tpu.dot_dimension_numbers<[1], [0], [0], [1], [0, 0, 1, 1], [], []>} : vector<16x768xbf16>, vector<768x128xbf16>, vector<16x128xf32> -> vector<16x128xf32>
    %3 = arith.mulf %2, %2 : vector<16x128xf32>
    %cst_3 = arith.constant dense<0.000000e+00> : vector<16xf32>
    %4 = vector.multi_reduction <add>, %3, %cst_3 [1] : vector<16x128xf32> to vector<16xf32>
    %5 = vector.shape_cast %4 : vector<16xf32> to vector<16x1xf32>
    %cst_4 = arith.constant 9.99999996E-13 : f32
    %6 = vector.broadcast %cst_4 : f32 to vector<16x1xf32>
    %7 = arith.addf %5, %6 : vector<16x1xf32>
    %8 = math.rsqrt %7 : vector<16x1xf32>
    %9 = vector.broadcast %8 : vector<16x1xf32> to vector<16x128xf32>
    %10 = arith.mulf %2, %9 : vector<16x128xf32>
    %11 = arith.truncf %10 : vector<16x128xf32> to vector<16x128xbf16>
    %c0_5 = arith.constant 0 : index
    %c0_6 = arith.constant 0 : index
    %12 = vector.load %arg3[%c0_5, %c0_6] : memref<128x128xbf16, #tpu.memory_space<vmem>>, vector<128x128xbf16>
    %cst_7 = arith.constant dense<0.000000e+00> : vector<16x128xf32>
    %13 = tpu.matmul %11, %12, %cst_7 {dimension_numbers = #tpu.dot_dimension_numbers<[1], [0], [0], [1], [0, 0, 1, 1], [], []>} : vector<16x128xbf16>, vector<128x128xbf16>, vector<16x128xf32> -> vector<16x128xf32>
    %c0_8 = arith.constant 0 : index
    %c0_9 = arith.constant 0 : index
    %14 = vector.load %arg4[%c0_8, %c0_9] : memref<16x128xf32, #tpu.memory_space<vmem>>, vector<16x128xf32>
    tpu.vector_store %arg4[%c0_8, %c0_9], %13 {strides = array<i32>} : memref<16x128xf32, #tpu.memory_space<vmem>>, vector<16x128xf32>,
    return
  }
  func.func @transform_0(%arg0: i32) -> (i32, i32) {
    %c0_i32 = arith.constant 0 : i32
    %c0_i32_0 = arith.constant 0 : i32
    return %arg0, %c0_i32 : i32, i32
  }
  func.func @transform_1(%arg0: i32) -> (i32, i32) {
    %c0_i32 = arith.constant 0 : i32
    %c0_i32_0 = arith.constant 0 : i32
    %c0_i32_1 = arith.constant 0 : i32
    return %c0_i32, %c0_i32_0 : i32, i32
  }
  func.func @transform_2(%arg0: i32) -> (i32, i32) {
    %c0_i32 = arith.constant 0 : i32
    %c0_i32_0 = arith.constant 0 : i32
    %c0_i32_1 = arith.constant 0 : i32
    return %c0_i32, %c0_i32_0 : i32, i32
  }
  func.func @transform_3(%arg0: i32) -> (i32, i32) {
    %c0_i32 = arith.constant 0 : i32
    %c0_i32_0 = arith.constant 0 : i32
    return %arg0, %c0_i32 : i32, i32
  }
}

</mosaic_0001>

<bundles_post_ra>
// kernel: _forward_impl.1
= control target key start
LH: loop header
LB: loop body
LE: loop exit
PB: predicated region body
PF: predicated region fallthrough
CT: control target
= control target key end

     0   :  { %s1177_s1 = inlined_call_operand.vmem [shape: bf16[768,128], index: 1, kind: input, shape index: {}]   ;;  %s1178_s0 = inlined_call_operand.vmem [shape: bf16[16,768], index: 0, kind: input, shape index: {}]   ;;  %s1179_s2 = inlined_call_operand.vmem [shape: bf16[128,128], index: 2, kind: input, shape index: {}]   ;;  %s1180_s3 = inlined_call_operand.vmem [shape: f32[16,128], index: 3, kind: output, shape index: {}]  }
   0x1   :  { %v894_v0 = vld [vmem:[%s1177_s1 + $0x38] sm:$0xff]  ;;  %v893_v4 = vld [vmem:[%s1177_s1 + $0x30] sm:$0xff]  ;;  %v892_v8 = vld [vmem:[%s1177_s1 + $0x28] sm:$0xff] }
   0x2   :  { %v902_v1 = vld [vmem:[%s1177_s1 + $0x78] sm:$0xff]  ;;  %434 = vmatpush.bf16.msra.mxu0 %v894_v0  ;;  %v901_v5 = vld [vmem:[%s1177_s1 + $0x70] sm:$0xff]  ;;  %v900_v9 = vld [vmem:[%s1177_s1 + $0x68] sm:$0xff] }
   0x3   :  { %v910_v2 = vld [vmem:[%s1177_s1 + $0xb8] sm:$0xff]  ;;  %448 = vmatpush.bf16.msra.mxu1 %v902_v1  ;;  %v909_v6 = vld [vmem:[%s1177_s1 + $0xb0] sm:$0xff]  ;;  %v908_v10 = vld [vmem:[%s1177_s1 + $0xa8] sm:$0xff] }
   0x4   :  { %v918_v3 = vld [vmem:[%s1177_s1 + $0xf8] sm:$0xff]  ;;  %462 = vmatpush.bf16.msra.mxu2 %v910_v2  ;;  %v917_v7 = vld [vmem:[%s1177_s1 + $0xf0] sm:$0xff]  ;;  %v916_v11 = vld [vmem:[%s1177_s1 + $0xe8] sm:$0xff] }
   0x5   :  { %476 = vmatpush.bf16.msra.mxu3 %v918_v3  ;;  %v891_v12 = vld [vmem:[%s1177_s1 + $0x20] sm:$0xff]  ;;  %v890_v16 = vld [vmem:[%s1177_s1 + $0x18] sm:$0xff]  ;;  %v889_v20 = vld [vmem:[%s1177_s1 + $0x10] sm:$0xff] }
   0x6   :  { %435 = vmatpush.bf16.msra.mxu0 %v893_v4  ;;  %v899_v13 = vld [vmem:[%s1177_s1 + $0x60] sm:$0xff]  ;;  %v898_v17 = vld [vmem:[%s1177_s1 + $0x58] sm:$0xff]  ;;  %v897_v21 = vld [vmem:[%s1177_s1 + $0x50] sm:$0xff] }
   0x7   :  { %449 = vmatpush.bf16.msra.mxu1 %v901_v5  ;;  %v907_v14 = vld [vmem:[%s1177_s1 + $0xa0] sm:$0xff]  ;;  %v906_v18 = vld [vmem:[%s1177_s1 + $0x98] sm:$0xff]  ;;  %v905_v22 = vld [vmem:[%s1177_s1 + $0x90] sm:$0xff] }
   0x8   :  { %463 = vmatpush.bf16.msra.mxu2 %v909_v6  ;;  %v915_v15 = vld [vmem:[%s1177_s1 + $0xe0] sm:$0xff]  ;;  %v914_v19 = vld [vmem:[%s1177_s1 + $0xd8] sm:$0xff]  ;;  %v913_v23 = vld [vmem:[%s1177_s1 + $0xd0] sm:$0xff] }
   0x9   :  { %477 = vmatpush.bf16.msra.mxu3 %v917_v7  ;;  %v888_v24 = vld [vmem:[%s1177_s1 + $0x8] sm:$0xff]  ;;  %v887_v28 = vld [vmem:[%s1177_s1] sm:$0xff]  ;;  %v926_v31 = vld [vmem:[%s1177_s1 + $0x138] sm:$0xff] }
   0xa   :  { %436 = vmatpush.bf16.msra.mxu0 %v892_v8  ;;  %v896_v25 = vld [vmem:[%s1177_s1 + $0x48] sm:$0xff]  ;;  %v895_v29 = vld [vmem:[%s1177_s1 + $0x40] sm:$0xff]  ;;  %v884_v33 = vld [vmem:[%s1178_s0 + $0x14] sm:$0xf0] }
   0xb   :  { %450 = vmatpush.bf16.msra.mxu1 %v900_v9  ;;  %v904_v26 = vld [vmem:[%s1177_s1 + $0x88] sm:$0xff]  ;;  %v903_v30 = vld [vmem:[%s1177_s1 + $0x80] sm:$0xff]  ;;  %v637_v35 = vld [vmem:[%s1178_s0 + $0x18] sm:$0xf0] }
   0xc   :  { %464 = vmatpush.bf16.msra.mxu2 %v908_v10  ;;  %v912_v27 = vld [vmem:[%s1177_s1 + $0xc8] sm:$0xff]  ;;  %v635_v32 = vld [vmem:[%s1178_s0] sm:$0xf]  ;;  %v881_v34 = vld [vmem:[%s1178_s0 + $0x4] sm:$0xf] }
   0xd   :  { %478 = vmatpush.bf16.msra.mxu3 %v916_v11  ;;  %v934_v36 = vld [vmem:[%s1177_s1 + $0x178] sm:$0xff]  ;;  %v643_v37 = vld [vmem:[%s1178_s0 + $0x8] sm:$0xf]  ;;  %v885_v38 = vld [vmem:[%s1178_s0 + $0x1c] sm:$0xf0]  ;;  %v636_v42 = vor.u32 %v884_v33, %v635_v32  ;;  %v640_v43 = vor.u32 %v881_v34, %v637_v35 }
   0xe   :  { %437 = vmatpush.bf16.msra.mxu0 %v891_v12  ;;  %v911_v39 = vld [vmem:[%s1177_s1 + $0xc0] sm:$0xff]  ;;  %v882_v40 = vld [vmem:[%s1178_s0 + $0xc] sm:$0xf]  ;;  %v644_v44 = vor.u32 %v885_v38, %v643_v37  ;;  %v925_v45 = vld [vmem:[%s1177_s1 + $0x130] sm:$0xff] }
   0xf   :  { %451 = vmatpush.bf16.msra.mxu1 %v899_v13  ;;  %v645_v41 = vld [vmem:[%s1178_s0 + $0x20] sm:$0xf0]  ;;  %v933_v47 = vld [vmem:[%s1177_s1 + $0x170] sm:$0xff]  ;;  %v924_v48 = vld [vmem:[%s1177_s1 + $0x128] sm:$0xff] }
  0x10   :  { %465 = vmatpush.bf16.msra.mxu2 %v907_v14  ;;  %v648_v46 = vor.u32 %v882_v40, %v645_v41  ;;  %v932_v49 = vld [vmem:[%s1177_s1 + $0x168] sm:$0xff]  ;;  %v923_v50 = vld [vmem:[%s1177_s1 + $0x120] sm:$0xff]  ;;  %v922_v52 = vld [vmem:[%s1177_s1 + $0x118] sm:$0xff] }
  0x11   :  { %479 = vmatpush.bf16.msra.mxu3 %v915_v15  ;;  %v931_v51 = vld [vmem:[%s1177_s1 + $0x160] sm:$0xff]  ;;  %v930_v53 = vld [vmem:[%s1177_s1 + $0x158] sm:$0xff]  ;;  %v921_v54 = vld [vmem:[%s1177_s1 + $0x110] sm:$0xff] }
  0x12   :  { %438 = vmatpush.bf16.msra.mxu0 %v890_v16  ;;  %v929_v55 = vld [vmem:[%s1177_s1 + $0x150] sm:$0xff]  ;;  %v920_v56 = vld [vmem:[%s1177_s1 + $0x108] sm:$0xff]  ;;  %v919_v58 = vld [vmem:[%s1177_s1 + $0x100] sm:$0xff] }
  0x13   :  { %452 = vmatpush.bf16.msra.mxu1 %v898_v17  ;;  %v928_v57 = vld [vmem:[%s1177_s1 + $0x148] sm:$0xff]  ;;  %v651_v59 = vld [vmem:[%s1178_s0 + $0x10] sm:$0xf]  ;;  %v927_v61 = vld [vmem:[%s1177_s1 + $0x140] sm:$0xff] }
  0x14   :  { %466 = vmatpush.bf16.msra.mxu2 %v906_v18  ;;  %v886_v60 = vld [vmem:[%s1178_s0 + $0x24] sm:$0xf0]  ;;  %v883_v62 = vld [vmem:[%s1178_s0 + $0x14] sm:$0xf]  ;;  %v653_v63 = vld [vmem:[%s1178_s0 + $0x28] sm:$0xf0] }
  0x15   :  { %480 = vmatpush.bf16.msra.mxu3 %v914_v19  ;;  %v652_v0 = vor.u32 %v886_v60, %v651_v59  ;;  %v656_v1 = vor.u32 %v883_v62, %v653_v63  ;;  %v936_v32 = vld [vmem:[%s1179_s2 + $0x8] sm:$0xff]  ;;  %v935_v33 = vld [vmem:[%s1179_s2] sm:$0xff] }
  0x16   :  { %439 = vmatpush.bf16.msra.mxu0 %v889_v20 }
  0x17   :  { %453 = vmatpush.bf16.msra.mxu1 %v897_v21 }
  0x18   :  { %467 = vmatpush.bf16.msra.mxu2 %v905_v22 }
  0x19   :  { %481 = vmatpush.bf16.msra.mxu3 %v913_v23 }
  0x1a   :  { %440 = vmatpush.bf16.msra.mxu0 %v888_v24 }
  0x1b   :  { %454 = vmatpush.bf16.msra.mxu1 %v896_v25 }
  0x1c   :  { %468 = vmatpush.bf16.msra.mxu2 %v904_v26  ;;  %v942_v26 = vld [vmem:[%s1179_s2 + $0x38] sm:$0xff] }
  0x1d   :  { %482 = vmatpush.bf16.msra.mxu3 %v912_v27  ;;  %v941_v27 = vld [vmem:[%s1179_s2 + $0x30] sm:$0xff] }
  0x1e   :  { %441 = vmatpush.bf16.msra.mxu0 %v887_v28  ;;  %v940_v28 = vld [vmem:[%s1179_s2 + $0x28] sm:$0xff] }
  0x1f   :  { %455 = vmatpush.bf16.msra.mxu1 %v895_v29  ;;  %v939_v29 = vld [vmem:[%s1179_s2 + $0x20] sm:$0xff] }
  0x20   :  { %469 = vmatpush.bf16.msra.mxu2 %v903_v30  ;;  %v938_v30 = vld [vmem:[%s1179_s2 + $0x18] sm:$0xff] }
  0x21   :  { %483 = vmatpush.bf16.msra.mxu3 %v911_v39  ;;  %442 = vmatmul.bf16.vlgmr.msra.gmra.mxu0 %v636_v42 }
  0x22   :  { %490 = vmatpush.bf16.msrb.mxu0 %v926_v31  ;;  %456 = vmatmul.bf16.vlgmr.msra.gmra.mxu1 %v640_v43  ;;  %v937_v31 = vld [vmem:[%s1179_s2 + $0x10] sm:$0xff] }
  0x23   :  { %504 = vmatpush.bf16.msrb.mxu1 %v934_v36  ;;  %470 = vmatmul.bf16.vlgmr.msra.gmra.mxu2 %v644_v44 }
  0x24   :  { %484 = vmatmul.bf16.vlgmr.msra.gmra.mxu3 %v648_v46  ;;  %613 = vmatpush.bf16.msrb.mxu2 %v942_v26 }
  0x26   :  { %491 = vmatpush.bf16.msrb.mxu0 %v925_v45 }
  0x27   :  { %505 = vmatpush.bf16.msrb.mxu1 %v933_v47 }
  0x28   :  { %614 = vmatpush.bf16.msrb.mxu2 %v941_v27 }
  0x2a   :  { %492 = vmatpush.bf16.msrb.mxu0 %v924_v48 }
  0x2b   :  { %506 = vmatpush.bf16.msrb.mxu1 %v932_v49 }
  0x2c   :  { %615 = vmatpush.bf16.msrb.mxu2 %v940_v28 }
  0x2e   :  { %493 = vmatpush.bf16.msrb.mxu0 %v923_v50 }
  0x2f   :  { %507 = vmatpush.bf16.msrb.mxu1 %v931_v51 }
  0x30   :  { %616 = vmatpush.bf16.msrb.mxu2 %v939_v29 }
  0x32   :  { %494 = vmatpush.bf16.msrb.mxu0 %v922_v52 }
  0x33   :  { %508 = vmatpush.bf16.msrb.mxu1 %v930_v53 }
  0x34   :  { %617 = vmatpush.bf16.msrb.mxu2 %v938_v30 }
  0x36   :  { %495 = vmatpush.bf16.msrb.mxu0 %v921_v54 }
  0x37   :  { %509 = vmatpush.bf16.msrb.mxu1 %v929_v55 }
  0x38   :  { %618 = vmatpush.bf16.msrb.mxu2 %v937_v31 }
  0x3a   :  { %496 = vmatpush.bf16.msrb.mxu0 %v920_v56 }
  0x3b   :  { %510 = vmatpush.bf16.msrb.mxu1 %v928_v57 }
  0x3c   :  { %619 = vmatpush.bf16.msrb.mxu2 %v936_v32 }
  0x3e   :  { %497 = vmatpush.bf16.msrb.mxu0 %v919_v58 }
  0x3f   :  { %511 = vmatpush.bf16.msrb.mxu1 %v927_v61 }
  0x40   :  { %620 = vmatpush.bf16.msrb.mxu2 %v935_v33 }
  0x41   :  { %498 = vmatmul.bf16.vlgmr.msrb.gmra.mxu0 %v652_v0 }
  0x42   :  { %512 = vmatmul.bf16.vlgmr.msrb.gmra.mxu1 %v656_v1 }
  0x9e   :  { %v443_v2 = vpop.f32.mrf.mxu0 }
  0x9f   :  { %v457_v3 = vpop.f32.mrf.mxu1 }
  0xa0   :  { %v458_v5 = vadd.f32 %v457_v3, %v443_v2 }
  0xa6   :  { %v471_v4 = vpop.f32.mrf.mxu2  ;;  %v445_v6 = vpop.f32.mrf.mxu0 }
  0xa7   :  { %v459_v7 = vpop.f32.mrf.mxu1  ;;  %v485_v8 = vpop.f32.mrf.mxu3  ;;  %v472_v9 = vadd.f32 %v471_v4, %v458_v5 }
  0xa8   :  { %v460_v11 = vadd.f32 %v459_v7, %v445_v6 }
  0xa9   :  { %v486_v10 = vadd.f32 %v485_v8, %v472_v9 }
  0xae   :  { %v473_v12 = vpop.f32.mrf.mxu2 }
  0xaf   :  { %v474_v16 = vadd.f32 %v473_v12, %v460_v11  ;;  %v487_v18 = vpop.f32.mrf.mxu3 }
  0xb1   :  { %v488_v20 = vadd.f32 %v487_v18, %v474_v16 }
  0xbe   :  { %v499_v13 = vpop.f32.mrf.mxu0 }
  0xbf   :  { %v500_v14 = vadd.f32 %v499_v13, %v486_v10  ;;  %v513_v15 = vpop.f32.mrf.mxu1 }
  0xc1   :  { %v514_v17 = vadd.f32 %v513_v15, %v500_v14 }
  0xc3   :  { %v518_v19 = vmul.f32 %v514_v17, %v514_v17 }
  0xc5   :  { %520 = vadd.xlane.f32.xlu0 %v518_v19 }
  0xc6   :  { %v501_v21 = vpop.f32.mrf.mxu0 }
  0xc7   :  { %v502_v22 = vadd.f32 %v501_v21, %v488_v20  ;;  %v515_v23 = vpop.f32.mrf.mxu1 }
  0xc9   :  { %v516_v24 = vadd.f32 %v515_v23, %v502_v22 }
  0xcb   :  { %v519_v25 = vmul.f32 %v516_v24, %v516_v24 }
  0xcd   :  { %522 = vadd.xlane.f32.xlu0 %v519_v25 }
 0x138   :  { %v521_v34 = vpop.xlane.xlu0 %520 }
 0x139   :  { %v524_v35 = vadd.f32 1e-12, %v521_v34 }
 0x13b   :  { %943 = vrsqrt.f32 %v524_v35  ;;  %vm532_vm1 = vweird.f32 %v524_v35 }
 0x140   :  { %v523_v36 = vpop.xlane.xlu0 %522 }
 0x141   :  { %v944_v37 = vpop.eup %943  ;;  %v525_v38 = vadd.f32 1e-12, %v523_v36 }
 0x142   :  { %v527_v39 = vmul.f32 %v944_v37, %v524_v35  ;;  %vm533_vm0 = vweird.f32 %v944_v37 }
 0x143   :  { %945 = vrsqrt.f32 %v525_v38  ;;  %vm534_vm3 = vmor %vm532_vm1, %vm533_vm0  ;;  %vm542_vm4 = vweird.f32 %v525_v38 }
 0x144   :  { %v528_v40 = vmul.f32 %v944_v37, %v527_v39 }
 0x146   :  { %v529_v41 = vmul.f32 0.5, %v528_v40 }
 0x148   :  { %v530_v43 = vsub.f32 1.5, %v529_v41 }
 0x149   :  { %v946_v42 = vpop.eup %945 }
 0x14a   :  { %v537_v44 = vmul.f32 %v946_v42, %v525_v38  ;;  %v531_v46 = vmul.f32 %v944_v37, %v530_v43  ;;  %vm543_vm2 = vweird.f32 %v946_v42 }
 0x14b   :  { %vm544_vm5 = vmor %vm542_vm4, %vm543_vm2 }
 0x14c   :  { %v538_v45 = vmul.f32 %v946_v42, %v537_v44  ;;  %v535_v50 = vsel %vm534_vm3, %v944_v37, %v531_v46 }
 0x14d   :  { %v546_v52 = vmul.f32 %v535_v50, %v514_v17 }
 0x14e   :  { %v539_v47 = vmul.f32 0.5, %v538_v45 }
 0x150   :  { %v540_v48 = vsub.f32 1.5, %v539_v47 }
 0x152   :  { %v541_v49 = vmul.f32 %v946_v42, %v540_v48 }
 0x154   :  { %v545_v51 = vsel %vm544_vm5, %v946_v42, %v541_v49 }
 0x155   :  { %v547_v53 = vmul.f32 %v545_v51, %v516_v24 }
 0x157   :  { %v548_v54 = vpack.c.bf16 %v547_v53, %v546_v52 }
 0x159   :  { %621 = vmatmul.bf16.vlgmr.msrb.gmra.mxu2 %v548_v54 }
 0x1dc   :  { %v622_v55 = vpop.f32.mrf.mxu2 }
 0x1dd   :  { %627 = vst [vmem:[%s1180_s3] sm:$0xff] %v622_v55 }
 0x1e4   :  { %v624_v56 = vpop.f32.mrf.mxu2 }
 0x1e5   :  { %628 = vst [vmem:[%s1180_s3 + $0x8] sm:$0xff] %v624_v56 }

</bundles_post_ra>
